<compile_context>
chip_gen: v7x
topology: tpu7x:2x2x1
jax: 0.10.0
libtpu: 0.0.40
codegen_flags: <defaults>
</compile_context>

<pallas_src>
import jax
import jax.numpy as jnp
from jax import lax
from jax.experimental import pallas as pl
from jax.experimental.pallas import tpu as pltpu


def _round_up(x: int, m: int) -> int:
    return ((x + m - 1) // m) * m


def _largest_divisor(m: int, max_d: int, min_steps: int = 1) -> int:
    """Largest d <= max_d dividing m with m // d >= min_steps (fallback 1)."""
    best = 1
    for d in range(1, max_d + 1):
        if m % d == 0 and m // d >= min_steps:
            best = d
    return best


def _make_linear_kernel(compute_dtype):
    """Kernel computing one (TB, TN) output tile, accumulating over K in-place.

    x_ref: (TB, TK) activation tile        (f32 in HBM; cast for the MXU)
    w_ref: (TK, TN) pre-transposed weight  ([in, out] layout -> no transpose)
    b_ref: (1,  TN) bias tile
    o_ref: (TB, TN) output tile; block index (i, j) is constant across the K
           grid axis, so it stays VMEM-resident and doubles as the accumulator.
    """

    def kernel(x_ref, w_ref, b_ref, o_ref):
        k = pl.program_id(2)

        @pl.when(k == 0)
        def _():
            # Initialize the resident output block with the broadcast bias.
            o_ref[...] = jnp.zeros_like(o_ref) + b_ref[...]

        o_ref[...] += lax.dot_general(
            x_ref[...].astype(compute_dtype),
            w_ref[...].astype(compute_dtype),
            dimension_numbers=(((1,), (0,)), ((), ())),
            preferred_element_type=jnp.float32,
        ).astype(o_ref.dtype)

    return kernel


class PallasLinear:
    """y = x @ weight.T + bias (PyTorch nn.Linear forward) via Pallas on TPU.

    Weight/bias padding, the [out, in] -> [in, out] transpose, and the optional
    bf16 cast all happen exactly once here (the weight is static), so the
    per-call path touches HBM only for x, the padded weight and the output.
    """

    def __init__(self, weight, bias, *, use_bf16: bool = False):
        out_dim, in_dim = weight.shape
        assert bias.shape == (out_dim,)
        self.in_dim = in_dim
        self.out_dim = out_dim
        self.compute_dtype = jnp.bfloat16 if use_bf16 else jnp.float32

        self.Kp = _round_up(in_dim, 128)   # padded contraction dim
        self.Np = _round_up(out_dim, 128)  # padded output dim (lane-dense)

        w_pad = jnp.pad(weight, ((0, self.Np - out_dim), (0, self.Kp - in_dim)))
        self.w_padded = jnp.asarray(w_pad.T, dtype=self.compute_dtype)  # [Kp, Np]
        self.b_padded = jnp.pad(bias, (0, self.Np - out_dim)).reshape(
            1, self.Np).astype(jnp.float32)

    def __call__(self, x, *, tile_b=None, tile_n=None, tile_k=None):
        B, in_dim = x.shape
        assert in_dim == self.in_dim, "input feature dim mismatch"

        # ---- tile selection (divisor-friendly -> minimal padding waste) ----
        Bp8 = _round_up(B, 8)
        if tile_b is None:
            tile_b = min(512, Bp8)
        Bp = _round_up(Bp8, tile_b)
        batch_steps = Bp // tile_b

        n_units = self.Np // 128
        k_units = self.Kp // 128
        if tile_n is None:
            # If the batch axis has a single grid step, keep >= 2 N steps so
            # both v7x TensorCores ("parallel" axes) get work.
            min_n_steps = 2 if (batch_steps == 1 and n_units >= 2) else 1
            tile_n = 128 * _largest_divisor(n_units, 4, min_steps=min_n_steps)
        if tile_k is None:
            tile_k = 128 * _largest_divisor(k_units, 8)

        assert tile_b % 8 == 0 and tile_n % 128 == 0 and tile_k % 128 == 0
        assert self.Np % tile_n == 0 and self.Kp % tile_k == 0, \
            "custom tiles must divide the 128-padded weight dims"

        # ---- per-call padding of x only (weight/bias were padded at init) ----
        xp = x
        if (Bp, self.Kp) != (B, in_dim):
            xp = jnp.pad(x, ((0, Bp - B), (0, self.Kp - in_dim)))

        grid = (Bp // tile_b, self.Np // tile_n, self.Kp // tile_k)

        w_bytes = jnp.dtype(self.compute_dtype).itemsize
        cost = pl.CostEstimate(
            flops=2 * Bp * self.Np * self.Kp,
            transcendentals=0,
            bytes_accessed=(xp.size * 4 + self.w_padded.size * w_bytes
                            + Bp * self.Np * 4 + self.b_padded.size * 4),
        )

        out = pl.pallas_call(
            _make_linear_kernel(self.compute_dtype),
            out_shape=jax.ShapeDtypeStruct((Bp, self.Np), jnp.float32),
            grid_spec=pltpu.PrefetchScalarGridSpec(
                num_scalar_prefetch=0,
                grid=grid,
                in_specs=[
                    # x tile: varies with (batch, k)
                    pl.BlockSpec((tile_b, tile_k), lambda i, j, k: (i, k)),
                    # pre-transposed weight tile [K, N]: varies with (k, n)
                    # TODO(synk): for the tiny-batch weight-HBM-bound regime,
                    # a 3-deep pipeline here (pipeline_mode=pl.Buffered(3)) can
                    # hide extra weight-DMA latency.
                    pl.BlockSpec((tile_k, tile_n), lambda i, j, k: (k, j)),
                    # bias tile: varies with n only
                    pl.BlockSpec((1, tile_n), lambda i, j, k: (0, j)),
                ],
                out_specs=pl.BlockSpec((tile_b, tile_n), lambda i, j, k: (i, j)),
            ),
            compiler_params=pltpu.CompilerParams(
                # K is a reduction into the resident output block -> last,
                # "arbitrary".  B and N are independent -> "parallel".
                dimension_semantics=("parallel", "parallel", "arbitrary"),
            ),
            cost_estimate=cost,
        )(xp, self.w_padded, self.b_padded)

        if (Bp, self.Np) != (B, self.out_dim):
            out = out[:B, :self.out_dim]
        return out


def linear_forward(x, weight, bias, **kwargs):
    """One-off functional form (prefer PallasLinear to amortize weight prep)."""
    return PallasLinear(weight, bias)(x, **kwargs)


if __name__ == "__main__":
    key = jax.random.PRNGKey(0)

    # --- Test 1: LinearModel(in_dim=32, out_dim=16), batch=8 (single-tile). ---
    B, IN_DIM, OUT_DIM = 8, 32, 16
    kx, kw, kb, key = jax.random.split(key, 4)
    bound = 1.0 / (IN_DIM ** 0.5)
    weight = jax.random.uniform(kw, (OUT_DIM, IN_DIM), jnp.float32,
                                minval=-bound, maxval=bound)
    bias = jax.random.uniform(kb, (OUT_DIM,), jnp.float32,
                              minval=-bound, maxval=bound)
    x = jax.random.normal(kx, (B, IN_DIM), jnp.float32)

    model = PallasLinear(weight, bias)          # weight padded/transposed once
    y = jax.block_until_ready(model(x))
    y_ref = x @ weight.T + bias
    assert y.shape == (B, OUT_DIM)
    assert jnp.allclose(y, y_ref, atol=1e-5, rtol=1e-5)

    # --- Test 2: full 3-D grid (2 batch x 2 N x 2 K steps), ragged batch. ---
    B2, IN2, OUT2 = 13, 256, 256
    kx2, kw2, kb2, key = jax.random.split(key, 4)
    bound2 = 1.0 / (IN2 ** 0.5)
    w2 = jax.random.uniform(kw2, (OUT2, IN2), jnp.float32,
                            minval=-bound2, maxval=bound2)
    b2 = jax.random.uniform(kb2, (OUT2,), jnp.float32,
                            minval=-bound2, maxval=bound2)
    x2 = jax.random.normal(kx2, (B2, IN2), jnp.float32)

    model2 = PallasLinear(w2, b2)
    y2 = jax.block_until_ready(model2(x2, tile_b=8, tile_n=128, tile_k=128))
    y2_ref = x2 @ w2.T + b2
    assert y2.shape == (B2, OUT2)
    assert jnp.allclose(y2, y2_ref, atol=1e-4, rtol=1e-4)

    # --- Test 3: optional bf16-operand path (f32 accumulation), looser tol. ---
    model3 = PallasLinear(w2, b2, use_bf16=True)
    y3 = jax.block_until_ready(model3(x2))
    assert y3.shape == (B2, OUT2)
    assert jnp.allclose(y3, y2_ref, atol=5e-2, rtol=5e-2)

    print("KERNEL_OK")
</pallas_src>

<mosaic_0001>
module attributes {stable_mosaic.version = 11 : i64} {
  func.func @kernel(%arg0: i32, %arg1: i32, %arg2: i32, %arg3: memref<8x128xf32, #tpu.memory_space<vmem>>, %arg4: memref<128x128xf32, #tpu.memory_space<vmem>>, %arg5: memref<1x128xf32, #tpu.memory_space<vmem>>, %arg6: memref<8x128xf32, #tpu.memory_space<vmem>>) attributes {dimension_semantics = [#tpu.dimension_semantics<parallel>, #tpu.dimension_semantics<parallel>, #tpu.dimension_semantics<arbitrary>], iteration_bounds = array<i64: 1, 1, 1>, scalar_prefetch = 0 : i64, scratch_operands = 0 : i64, tpu.core_type = #tpu.core_type<tc>, window_params = [{transform_indices = @transform_0, window_bounds = array<i64: 8, 128>}, {transform_indices = @transform_1, window_bounds = array<i64: 128, 128>}, {transform_indices = @transform_2, window_bounds = array<i64: 1, 128>}, {transform_indices = @transform_3, window_bounds = array<i64: 8, 128>}]} {
    %c0_i32 = arith.constant 0 : i32
    %0 = arith.cmpi eq, %arg2, %c0_i32 : i32
    %1 = arith.extui %0 : i1 to i32
    %c0_i32_0 = arith.constant 0 : i32
    %2 = arith.cmpi ne, %1, %c0_i32_0 : i32
    scf.if %2 {
      %cst_8 = arith.constant 0.000000e+00 : f32
      %9 = vector.broadcast %cst_8 : f32 to vector<8x128xf32>
      %c0_9 = arith.constant 0 : index
      %c0_10 = arith.constant 0 : index
      %10 = vector.load %arg5[%c0_9, %c0_10] : memref<1x128xf32, #tpu.memory_space<vmem>>, vector<1x128xf32>
      %11 = vector.broadcast %10 : vector<1x128xf32> to vector<8x128xf32>
      %12 = arith.addf %9, %11 : vector<8x128xf32>
      %c0_11 = arith.constant 0 : index
      %c0_12 = arith.constant 0 : index
      %13 = vector.load %arg6[%c0_11, %c0_12] : memref<8x128xf32, #tpu.memory_space<vmem>>, vector<8x128xf32>
      tpu.vector_store %arg6[%c0_11, %c0_12], %12 {strides = array<i32>} : memref<8x128xf32, #tpu.memory_space<vmem>>, vector<8x128xf32>,
    } else {
    }
    %c0 = arith.constant 0 : index
    %c0_1 = arith.constant 0 : index
    %3 = vector.load %arg6[%c0, %c0_1] : memref<8x128xf32, #tpu.memory_space<vmem>>, vector<8x128xf32>
    %c0_2 = arith.constant 0 : index
    %c0_3 = arith.constant 0 : index
    %4 = vector.load %arg3[%c0_2, %c0_3] : memref<8x128xf32, #tpu.memory_space<vmem>>, vector<8x128xf32>
    %c0_4 = arith.constant 0 : index
    %c0_5 = arith.constant 0 : index
    %5 = vector.load %arg4[%c0_4, %c0_5] : memref<128x128xf32, #tpu.memory_space<vmem>>, vector<128x128xf32>
    %cst = arith.constant dense<0.000000e+00> : vector<8x128xf32>
    %6 = tpu.matmul %4, %5, %cst {dimension_numbers = #tpu.dot_dimension_numbers<[1], [0], [0], [1], [0, 0, 1, 1], [], []>} : vector<8x128xf32>, vector<128x128xf32>, vector<8x128xf32> -> vector<8x128xf32>
    %7 = arith.addf %3, %6 : vector<8x128xf32>
    %c0_6 = arith.constant 0 : index
    %c0_7 = arith.constant 0 : index
    %8 = vector.load %arg6[%c0_6, %c0_7] : memref<8x128xf32, #tpu.memory_space<vmem>>, vector<8x128xf32>
    tpu.vector_store %arg6[%c0_6, %c0_7], %7 {strides = array<i32>} : memref<8x128xf32, #tpu.memory_space<vmem>>, vector<8x128xf32>,
    return
  }
  func.func @transform_0(%arg0: i32, %arg1: i32, %arg2: i32) -> (i32, i32) {
    %c0_i32 = arith.constant 0 : i32
    return %arg0, %arg2 : i32, i32
  }
  func.func @transform_1(%arg0: i32, %arg1: i32, %arg2: i32) -> (i32, i32) {
    %c0_i32 = arith.constant 0 : i32
    return %arg2, %arg1 : i32, i32
  }
  func.func @transform_2(%arg0: i32, %arg1: i32, %arg2: i32) -> (i32, i32) {
    %c0_i32 = arith.constant 0 : i32
    %c0_i32_0 = arith.constant 0 : i32
    return %c0_i32, %arg1 : i32, i32
  }
  func.func @transform_3(%arg0: i32, %arg1: i32, %arg2: i32) -> (i32, i32) {
    %c0_i32 = arith.constant 0 : i32
    return %arg0, %arg1 : i32, i32
  }
}

</mosaic_0001>

<bundles_post_ra>
// kernel: tpu_custom_call.1
= control target key start
LH: loop header
LB: loop body
LE: loop exit
PB: predicated region body
PF: predicated region fallthrough
CT: control target
= control target key end

     0   :  { %8 = vsyncpa [#allocation3], 0  ;;  %s391_s0 = inlined_call_operand.hbm [shape: f32[8,128], index: 0, kind: input, shape index: {}]   ;;  %s392_s1 = inlined_call_operand.hbm [shape: f32[128,128], index: 1, kind: input, shape index: {}]   ;;  %s393_s2 = inlined_call_operand.vmem [shape: f32[1,128], index: 2, kind: input, shape index: {}]   ;;  %s394_s3 = inlined_call_operand.hbm [shape: f32[8,128], index: 3, kind: output, shape index: {}]  }
   0x1   :  { %9 = vsyncpa [#allocation6], 0 }
   0x2   :  { %10 = vsyncpa [#allocation4], 0  ;;  %s317_s12 = smov [#allocation2]   ;;  %s318_s14 = smov [#allocation5]  }
   0x3   :  { %s17_s13 = sshll.u32 %s317_s12, 4  ;;  %s26_s15 = sshll.u32 %s318_s14, 4  ;;  %s18_s13 = int_to_ptr.vmem [resolvable:$true] %s17_s13  ;;  %s345_s15 = int_to_ptr.vmem [resolvable:$true] %s26_s15 }
   0x4   :  { %s245_s18 = scalar_lea.hbm %s391_s0, 128 }
   0x5   :  { %p246_p0 = scmp.ne.s32.totalorder %s391_s0, %s245_s18  ;;  %p249_p1 = scmp.lt.u32.totalorder %s245_s18, %s391_s0 }
   0x7   :  { %p251_p2 = pnand %p249_p1, %p246_p0 }
   0x9   :  { %254 = shalt.err (!%p251_p2)
}
   0xa   :  { %s255_s23 = scalar_lea.vmem %s18_s13, 128  ;;  %p260_p4 = scmp.lt.s32.totalorder %s18_s13, %s18_s13 }
   0xb   :  { %p256_p3 = scmp.ne.s32.totalorder %s18_s13, %s255_s23  ;;  %p261_p5 = scmp.lt.s32.totalorder %s255_s23, %s255_s23 }
   0xd   :  { %p262_p6 = por %p261_p5, %p260_p4 }
   0xf   :  { %p263_p7 = pnand %p262_p6, %p256_p3 }
  0x11   :  { %266 = shalt.err (!%p263_p7)
}
  0x12   :  { %20 = dma.hbm_to_vmem [thread:$0]  %s391_s0, 128, %s18_s13, [#allocation3]  }
  0x13   :  { %s267_s28 = scalar_lea.hbm %s392_s1, 2048 }
  0x14   :  { %p268_p8 = scmp.ne.s32.totalorder %s392_s1, %s267_s28  ;;  %p271_p9 = scmp.lt.u32.totalorder %s267_s28, %s392_s1 }
  0x16   :  { %p273_p10 = pnand %p271_p9, %p268_p8 }
  0x18   :  { %276 = shalt.err (!%p273_p10)
}
  0x19   :  { %s277_s6 = scalar_lea.vmem %s345_s15, 2048  ;;  %p282_p12 = scmp.lt.s32.totalorder %s345_s15, %s345_s15 }
  0x1a   :  { %p278_p11 = scmp.ne.s32.totalorder %s345_s15, %s277_s6  ;;  %p283_p13 = scmp.lt.s32.totalorder %s277_s6, %s277_s6 }
  0x1c   :  { %p284_p0 = por %p283_p13, %p282_p12 }
  0x1e   :  { %p285_p1 = pnand %p284_p0, %p278_p11 }
  0x20   :  { %288 = shalt.err (!%p285_p1)
}
  0x21   :  { %s319_s0 = smov 128   ;;  %s320_s7 = smov 8  }
  0x22   :  { %32 = dma.hbm_to_vmem [thread:$0]  %s392_s1, 2048, %s345_s15, [#allocation6], %s319_s0, %s319_s0, %s320_s7  }
  0x23   :  { %311 = dma.done.wait [#allocation3], 128  }
  0x24   :  { %312 = vsyncadd [#allocation3], 4294967168 }
  0x25   :  { %313 = dma.done.wait [#allocation6], 2048  }
  0x26   :  { %314 = vsyncadd [#allocation6], 4294965248  ;;  %v321_v0 = vmov 0.0|0.0   ;;  %vm322_vm0 = vmmov 0   ;;  %v323_v1 = vmov 0.0   ;;  %v56_v2 = vld [vmem:[#allocation5] sm:$0xff] }
  0x27   :  { %213 = vmatprep.subr.bf16.mxu0 %v321_v0  ;;  %210 = vmatprep.mubr.msk.f32.mxu0 %vm322_vm0, %v323_v1  ;;  %v57_v3 = vld [vmem:[#allocation5 + $0x8] sm:$0xff]  ;;  %v58_v4 = vld [vmem:[#allocation5 + $0x10] sm:$0xff]  ;;  %v59_v6 = vld [vmem:[#allocation5 + $0x18] sm:$0xff]  ;;  %s324_s11 = smov [#allocation7]  }
  0x28   :  { %v214_v5 = vpack.c.bf16 %v57_v3, %v56_v2  ;;  %v217_v7 = vpack.c.bf16 %v59_v6, %v58_v4  ;;  %v60_v8 = vld [vmem:[#allocation5 + $0x20] sm:$0xff]  ;;  %v61_v9 = vld [vmem:[#allocation5 + $0x28] sm:$0xff]  ;;  %v62_v11 = vld [vmem:[#allocation5 + $0x30] sm:$0xff]  ;;  %s150_s12 = sshll.u32 %s324_s11, 4  ;;  %s151_s12 = int_to_ptr.vmem [resolvable:$true] %s150_s12 }
  0x29   :  { %v220_v10 = vpack.c.bf16 %v61_v9, %v60_v8  ;;  %v63_v12 = vld [vmem:[#allocation5 + $0x38] sm:$0xff]  ;;  %v64_v14 = vld [vmem:[#allocation5 + $0x40] sm:$0xff]  ;;  %v65_v15 = vld [vmem:[#allocation5 + $0x48] sm:$0xff]  ;;  %s289_s13 = scalar_lea.vmem %s151_s12, 128  ;;  %p294_p3 = scmp.lt.s32.totalorder %s151_s12, %s151_s12 }
  0x2a   :  { %215 = vmatpush3.bf16.msra.mxu0 %v214_v5  ;;  %v223_v13 = vpack.c.bf16 %v63_v12, %v62_v11  ;;  %v226_v16 = vpack.c.bf16 %v65_v15, %v64_v14  ;;  %v66_v17 = vld [vmem:[#allocation5 + $0x50] sm:$0xff]  ;;  %v67_v18 = vld [vmem:[#allocation5 + $0x58] sm:$0xff]  ;;  %v68_v20 = vld [vmem:[#allocation5 + $0x60] sm:$0xff]  ;;  %p290_p2 = scmp.ne.s32.totalorder %s151_s12, %s289_s13  ;;  %p295_p4 = scmp.lt.s32.totalorder %s289_s13, %s289_s13 }
  0x2b   :  { %216 = vmatprep.subr.bf16.mxu0 %v321_v0  ;;  %v229_v19 = vpack.c.bf16 %v67_v18, %v66_v17  ;;  %v69_v21 = vld [vmem:[#allocation5 + $0x68] sm:$0xff]  ;;  %v70_v23 = vld [vmem:[#allocation5 + $0x70] sm:$0xff]  ;;  %v71_v24 = vld [vmem:[#allocation5 + $0x78] sm:$0xff] }
  0x2c   :  { %v232_v22 = vpack.c.bf16 %v69_v21, %v68_v20  ;;  %v235_v25 = vpack.c.bf16 %v71_v24, %v70_v23  ;;  %v55_v26 = vld [vmem:[#allocation2] sm:$0xff]  ;;  %p296_p5 = por %p295_p4, %p294_p3 }
  0x2d   :  { %v160_v27 = vld [vmem:[%s393_s2] ss:$0 sm:$0xff] }
  0x2e   :  { %218 = vmatpush3.bf16.msra.mxu0 %v217_v7  ;;  %p297_p6 = pnand %p296_p5, %p290_p2 }
  0x2f   :  { %219 = vmatprep.subr.bf16.mxu0 %v321_v0 }
  0x32   :  { %221 = vmatpush3.bf16.msra.mxu0 %v220_v10 }
  0x33   :  { %222 = vmatprep.subr.bf16.mxu0 %v321_v0 }
  0x36   :  { %224 = vmatpush3.bf16.msra.mxu0 %v223_v13 }
  0x37   :  { %225 = vmatprep.subr.bf16.mxu0 %v321_v0 }
  0x3a   :  { %227 = vmatpush3.bf16.msra.mxu0 %v226_v16 }
  0x3b   :  { %228 = vmatprep.subr.bf16.mxu0 %v321_v0 }
  0x3e   :  { %230 = vmatpush3.bf16.msra.mxu0 %v229_v19 }
  0x3f   :  { %231 = vmatprep.subr.bf16.mxu0 %v321_v0 }
  0x42   :  { %233 = vmatpush3.bf16.msra.mxu0 %v232_v22 }
  0x43   :  { %234 = vmatprep.subr.bf16.mxu0 %v321_v0 }
  0x46   :  { %236 = vmatpush3.bf16.msra.mxu0 %v235_v25 }
  0x49   :  { %211 = vmatmul.mubr.f32.vlgmr.msra.gmra.mrb[0].mxu0 %v55_v26 }
 0x11c   :  { %v138_v28 = vpop.f32.mrb[0].mxu0 }
 0x11d   :  { %v142_v29 = vadd.f32 %v160_v27, %v138_v28  ;;  %v212_v30 = vpop.f32.mrb[1].mxu0 }
 0x11f   :  { %143 = vst [vmem:[#allocation7] sm:$0xff] %v142_v29 }
 0x120   :  { %300 = shalt.err (!%p297_p6)
}
 0x121   :  { %s301_s16 = scalar_lea.hbm %s394_s3, 128 }
 0x122   :  { %p302_p7 = scmp.ne.s32.totalorder %s394_s3, %s301_s16  ;;  %p305_p8 = scmp.lt.u32.totalorder %s301_s16, %s394_s3 }
 0x124   :  { %p307_p9 = pnand %p305_p8, %p302_p7 }
 0x126   :  { %310 = shalt.err (!%p307_p9)
}
 0x127   :  { %153 = dma.vmem_to_hbm [thread:$0]  %s151_s12, 128, %s394_s3, [#allocation4]  }
 0x128   :  { %315 = dma.done.wait [#allocation4], 128  }
 0x129   :  { %316 = vsyncadd [#allocation4], 4294967168 }
 0x12a   :  { %157 = vsyncpa [#allocation3], 1 }
 0x12b   :  { %158 = vsyncpa [#allocation6], 1 }
 0x12c   :  { %159 = vsyncpa [#allocation4], 1 }

</bundles_post_ra>
